<compile_context>
chip_gen: v7x
topology: tpu7x:2x2x1
jax: 0.10.0
libtpu: 0.0.40
codegen_flags: <defaults>
</compile_context>

<pallas_src>
from functools import partial

import jax
import jax.numpy as jnp
from jax.experimental import pallas as pl
from jax.experimental.pallas import tpu as pltpu


def _mlp_kernel(x_ref, w1_ref, b1_ref, w2_ref, b2_ref, out_ref):
    # In-kernel cast of x to the weight dtype (bf16 on the fast MXU path; a
    # no-op for f32 weights).  Casting here avoids an extra HBM pass over x
    # in the wrapper.
    x = x_ref[...].astype(w1_ref.dtype)

    # Layer 1: (TB, D) @ (D, H) -> f32 accumulate on the MXU.
    # With obs_dim ~ 8 the MXU is only 8/128 (v5e) or 8/256 (v6e/v7x) utilized
    # on K, but the MXU is not the binding slot here (the kernel is HBM /
    # pipeline-overhead bound), so the simple dot is kept.
    h = jnp.dot(x, w1_ref[...], preferred_element_type=jnp.float32)

    # Bias + ReLU epilogue in f32 (VPU; v5e has no bf16 VALU path).
    h = jnp.maximum(h + b1_ref[...], 0.0)

    # Layer 2: (TB, H) @ (H, A_pad) -> f32 accumulate (A_pad = 128-lane-padded
    # copy of W2; padded columns never leave VMEM).
    y = jnp.dot(h.astype(w2_ref.dtype), w2_ref[...],
                preferred_element_type=jnp.float32)

    # Slice back to the real n_actions before the store: only the exact
    # (TB, A) block goes to HBM.  The narrow masked store inside VMEM is
    # cheap; the 32x-inflated HBM writeback was the expensive part.
    a = out_ref.shape[-1]
    out_ref[...] = (y[:, :a] + b2_ref[...]).astype(out_ref.dtype)


@partial(jax.jit, static_argnames=("block_b", "use_bf16"))
def net_forward(x, w1, b1, w2, b2, *, block_b=2048, use_bf16=True):
    """x: (B, obs_dim) float32 -> (B, n_actions) float32.

    block_b: max batch rows per grid step (rounded to a multiple of 8).  At
    the default 2048 the per-step VMEM footprint (double-buffered x/out plus
    kernel temporaries) is ~10-12 MiB, inside the scoped-VMEM default on
    every generation (v5e 16 MiB default is raised to 32 MiB below).  If you
    push block_b toward 8192, raise vmem_limit_bytes accordingly (mind v7x's
    64 MiB physical VMEM).
    """
    B, D = x.shape
    H = w1.shape[1]
    A = w2.shape[1]

    # Pad W2's output dim to a multiple of 128 lanes for the MXU matmul only.
    # This is a one-time ~4 KiB pad of a parameter; the padded columns are
    # sliced away inside the kernel before the HBM store.
    A_pad = max(128, pl.cdiv(A, 128) * 128)
    if A_pad != A:
        w2 = jnp.pad(w2, ((0, 0), (0, A_pad - A)))

    # dtype staging: cast only the (tiny) weights; x stays f32 in HBM and is
    # cast to bf16 inside the kernel, avoiding a separate wrapper pass.
    wdt = jnp.bfloat16 if use_bf16 else jnp.float32
    w1 = w1.astype(wdt)
    w2 = w2.astype(wdt)
    b1 = b1.astype(jnp.float32)
    b2 = b2.astype(jnp.float32)

    # ---- batch tiling ------------------------------------------------------
    # Big tiles amortize the ~0.35 us/step pipeline overhead; keep >= 2 grid
    # steps when possible so v7x's 2 TensorCores both get work.  Ragged
    # batches are handled by Pallas boundary masking (no jnp.pad of x).
    if B < 8:
        tb = B                                    # block == full dim is legal
    else:
        b8 = ((B + 7) // 8) * 8
        tb = min(((block_b + 7) // 8) * 8, b8)
        if tb >= b8 and b8 >= 16:                 # single step -> split in two
            tb = (((b8 + 1) // 2) + 7) // 8 * 8
    grid = (pl.cdiv(B, tb),)

    wbytes = 2 if use_bf16 else 4
    cost = pl.CostEstimate(
        flops=2 * B * (D * H + H * A_pad),
        transcendentals=0,
        bytes_accessed=(B * D * 4 + B * A * 4            # x in, out (unpadded)
                        + D * H * wbytes + H * A_pad * wbytes
                        + H * 4 + A * 4),                 # biases
    )

    return pl.pallas_call(
        _mlp_kernel,
        out_shape=jax.ShapeDtypeStruct((B, A), jnp.float32),
        grid=grid,
        in_specs=[
            pl.BlockSpec((tb, D), lambda i: (i, 0)),      # x: tiled over batch
            pl.BlockSpec((D, H), lambda i: (0, 0)),       # W1: resident in VMEM
            pl.BlockSpec((1, H), lambda i: (0, 0)),       # b1: resident
            pl.BlockSpec((H, A_pad), lambda i: (0, 0)),   # W2 (lane-padded): resident
            pl.BlockSpec((1, A), lambda i: (0, 0)),       # b2: resident
        ],
        out_specs=pl.BlockSpec((tb, A), lambda i: (i, 0)),
        compiler_params=pltpu.CompilerParams(
            dimension_semantics=("parallel",),
            # Raise v5e's 16 MiB scoped default to 32 MiB (== v6e/v7x default);
            # well under physical VMEM on every generation.
            vmem_limit_bytes=32 * 1024 * 1024,
        ),
        cost_estimate=cost,
    )(x, w1, b1, w2, b2)


def init_params(key, obs_dim, hidden, n_actions):
    """Deterministic PyTorch-style uniform(-1/sqrt(fan_in), 1/sqrt(fan_in)) init."""
    k1, k2, k3, k4 = jax.random.split(key, 4)
    bound1 = 1.0 / jnp.sqrt(jnp.float32(obs_dim))
    bound2 = 1.0 / jnp.sqrt(jnp.float32(hidden))
    w1 = jax.random.uniform(k1, (obs_dim, hidden), jnp.float32, -bound1, bound1)
    b1 = jax.random.uniform(k2, (1, hidden), jnp.float32, -bound1, bound1)
    w2 = jax.random.uniform(k3, (hidden, n_actions), jnp.float32, -bound2, bound2)
    b2 = jax.random.uniform(k4, (1, n_actions), jnp.float32, -bound2, bound2)
    return w1, b1, w2, b2


if __name__ == "__main__":
    obs_dim = 8        # obs_shape[0]
    n_actions = 4
    hidden = 256

    key = jax.random.PRNGKey(0)
    kx, kp, kb, kr = jax.random.split(key, 4)
    w1, b1, w2, b2 = init_params(kp, obs_dim, hidden, n_actions)

    def ref_fn(x):
        return jnp.maximum(x @ w1 + b1, 0.0) @ w2 + b2

    # 1) Small batch, f32 path (tight tolerance), single grid step.
    x = jax.random.normal(kx, (8, obs_dim), jnp.float32)
    out = jax.block_until_ready(net_forward(x, w1, b1, w2, b2, use_bf16=False))
    assert out.shape == (8, n_actions)
    assert jnp.allclose(out, ref_fn(x), atol=1e-5, rtol=1e-5)

    # 2) Default (bf16 MXU) path: B=1024, default block_b -> tile split into
    #    two grid steps (v7x-friendly), weights resident across steps.
    xb = jax.random.normal(kb, (1024, obs_dim), jnp.float32)
    outb = jax.block_until_ready(net_forward(xb, w1, b1, w2, b2))
    assert outb.shape == (1024, n_actions)
    assert jnp.allclose(outb, ref_fn(xb), atol=5e-2, rtol=5e-2)

    # 3) Ragged batch (not a multiple of the tile): handled by Pallas boundary
    #    masking with no jnp.pad copy of x (grid = cdiv(1000, 384) = 3).
    xr = jax.random.normal(kr, (1000, obs_dim), jnp.float32)
    outr = jax.block_until_ready(net_forward(xr, w1, b1, w2, b2, block_b=384))
    assert outr.shape == (1000, n_actions)
    assert jnp.allclose(outr, ref_fn(xr), atol=5e-2, rtol=5e-2)

    print("KERNEL_OK")
</pallas_src>

<mosaic_0001>
module attributes {stable_mosaic.version = 11 : i64} {
  func.func @_mlp_kernel(%arg0: i32, %arg1: memref<8x8xf32, #tpu.memory_space<vmem>>, %arg2: memref<8x256xf32, #tpu.memory_space<vmem>>, %arg3: memref<1x256xf32, #tpu.memory_space<vmem>>, %arg4: memref<256x128xf32, #tpu.memory_space<vmem>>, %arg5: memref<1x4xf32, #tpu.memory_space<vmem>>, %arg6: memref<8x4xf32, #tpu.memory_space<vmem>>) attributes {dimension_semantics = [#tpu.dimension_semantics<parallel>], iteration_bounds = array<i64: 1>, scalar_prefetch = 0 : i64, scratch_operands = 0 : i64, tpu.core_type = #tpu.core_type<tc>, window_params = [{transform_indices = @transform_0, window_bounds = array<i64: 8, 8>}, {pipeline_mode = #tpu.pipeline_mode<synchronous>, transform_indices = @transform_1, window_bounds = array<i64: 8, 256>}, {pipeline_mode = #tpu.pipeline_mode<synchronous>, transform_indices = @transform_2, window_bounds = array<i64: 1, 256>}, {pipeline_mode = #tpu.pipeline_mode<synchronous>, transform_indices = @transform_3, window_bounds = array<i64: 256, 128>}, {pipeline_mode = #tpu.pipeline_mode<synchronous>, transform_indices = @transform_4, window_bounds = array<i64: 1, 4>}, {transform_indices = @transform_5, window_bounds = array<i64: 8, 4>}]} {
    %c0 = arith.constant 0 : index
    %c0_0 = arith.constant 0 : index
    %0 = vector.load %arg1[%c0, %c0_0] : memref<8x8xf32, #tpu.memory_space<vmem>>, vector<8x8xf32>
    %c0_1 = arith.constant 0 : index
    %c0_2 = arith.constant 0 : index
    %1 = vector.load %arg2[%c0_1, %c0_2] : memref<8x256xf32, #tpu.memory_space<vmem>>, vector<8x256xf32>
    %cst = arith.constant dense<0.000000e+00> : vector<8x256xf32>
    %2 = tpu.matmul %0, %1, %cst {dimension_numbers = #tpu.dot_dimension_numbers<[1], [0], [0], [1], [0, 0, 1, 1], [], []>} : vector<8x8xf32>, vector<8x256xf32>, vector<8x256xf32> -> vector<8x256xf32>
    %c0_3 = arith.constant 0 : index
    %c0_4 = arith.constant 0 : index
    %3 = vector.load %arg3[%c0_3, %c0_4] : memref<1x256xf32, #tpu.memory_space<vmem>>, vector<1x256xf32>
    %4 = vector.broadcast %3 : vector<1x256xf32> to vector<8x256xf32>
    %5 = arith.addf %2, %4 : vector<8x256xf32>
    %cst_5 = arith.constant 0.000000e+00 : f32
    %6 = vector.broadcast %cst_5 : f32 to vector<8x256xf32>
    %7 = arith.maximumf %5, %6 : vector<8x256xf32>
    %c0_6 = arith.constant 0 : index
    %c0_7 = arith.constant 0 : index
    %8 = vector.load %arg4[%c0_6, %c0_7] : memref<256x128xf32, #tpu.memory_space<vmem>>, vector<256x128xf32>
    %cst_8 = arith.constant dense<0.000000e+00> : vector<8x128xf32>
    %9 = tpu.matmul %7, %8, %cst_8 {dimension_numbers = #tpu.dot_dimension_numbers<[1], [0], [0], [1], [0, 0, 1, 1], [], []>} : vector<8x256xf32>, vector<256x128xf32>, vector<8x128xf32> -> vector<8x128xf32>
    %10 = vector.extract_strided_slice %9 {offsets = [0, 0], sizes = [8, 4], strides = [1, 1]} : vector<8x128xf32> to vector<8x4xf32>
    %c0_9 = arith.constant 0 : index
    %c0_10 = arith.constant 0 : index
    %11 = vector.load %arg5[%c0_9, %c0_10] : memref<1x4xf32, #tpu.memory_space<vmem>>, vector<1x4xf32>
    %12 = vector.broadcast %11 : vector<1x4xf32> to vector<8x4xf32>
    %13 = arith.addf %10, %12 : vector<8x4xf32>
    %c0_11 = arith.constant 0 : index
    %c0_12 = arith.constant 0 : index
    %14 = vector.load %arg6[%c0_11, %c0_12] : memref<8x4xf32, #tpu.memory_space<vmem>>, vector<8x4xf32>
    tpu.vector_store %arg6[%c0_11, %c0_12], %13 {strides = array<i32>} : memref<8x4xf32, #tpu.memory_space<vmem>>, vector<8x4xf32>,
    return
  }
  func.func @transform_0(%arg0: i32) -> (i32, i32) {
    %c0_i32 = arith.constant 0 : i32
    %c0_i32_0 = arith.constant 0 : i32
    return %arg0, %c0_i32 : i32, i32
  }
  func.func @transform_1(%arg0: i32) -> (i32, i32) {
    %c0_i32 = arith.constant 0 : i32
    %c0_i32_0 = arith.constant 0 : i32
    %c0_i32_1 = arith.constant 0 : i32
    return %c0_i32, %c0_i32_0 : i32, i32
  }
  func.func @transform_2(%arg0: i32) -> (i32, i32) {
    %c0_i32 = arith.constant 0 : i32
    %c0_i32_0 = arith.constant 0 : i32
    %c0_i32_1 = arith.constant 0 : i32
    return %c0_i32, %c0_i32_0 : i32, i32
  }
  func.func @transform_3(%arg0: i32) -> (i32, i32) {
    %c0_i32 = arith.constant 0 : i32
    %c0_i32_0 = arith.constant 0 : i32
    %c0_i32_1 = arith.constant 0 : i32
    return %c0_i32, %c0_i32_0 : i32, i32
  }
  func.func @transform_4(%arg0: i32) -> (i32, i32) {
    %c0_i32 = arith.constant 0 : i32
    %c0_i32_0 = arith.constant 0 : i32
    %c0_i32_1 = arith.constant 0 : i32
    return %c0_i32, %c0_i32_0 : i32, i32
  }
  func.func @transform_5(%arg0: i32) -> (i32, i32) {
    %c0_i32 = arith.constant 0 : i32
    %c0_i32_0 = arith.constant 0 : i32
    return %arg0, %c0_i32 : i32, i32
  }
}

</mosaic_0001>

<bundles_post_ra>
// kernel: net_forward.1
= control target key start
LH: loop header
LB: loop body
LE: loop exit
PB: predicated region body
PF: predicated region fallthrough
CT: control target
= control target key end

     0   :  { %v298_v2 = vmov 0.0   ;;  %vm35_vm0 = vcmask 64512   ;;  %v25_v52 = vlaneseq  ;;  %vm222_vm1 = vcmask 31744   ;;  %s443_s1 = inlined_call_operand.vmem [shape: f32[8,256], index: 1, kind: input, shape index: {}]   ;;  %s444_s0 = inlined_call_operand.vmem [shape: f32[8,8], index: 0, kind: input, shape index: {}]   ;;  %s445_s3 = inlined_call_operand.vmem [shape: f32[256,128], index: 3, kind: input, shape index: {}]   ;;  %s446_s2 = inlined_call_operand.vmem [shape: f32[1,256], index: 2, kind: input, shape index: {}]   ;;  %s447_s4 = inlined_call_operand.vmem [shape: f32[1,4], index: 4, kind: input, shape index: {}]   ;;  %s448_s5 = inlined_call_operand.vmem [shape: f32[8,4], index: 5, kind: output, shape index: {}]  }
   0x1   :  { %v22_v0 = vld [vmem:[%s443_s1 + $0x8] sm:$0xff]  ;;  %v21_v1 = vld [vmem:[%s443_s1] sm:$0xff]  ;;  %103 = vmatprep.mubr.f32.mxu0 %v298_v2  ;;  %v130_v9 = vld [vmem:[%s445_s3 + $0x90] sm:$0xff] }
   0x2   :  { %v20_v3 = vld [vmem:[%s444_s0] sm:$0xff]  ;;  %39 = vmatprep.subr.mxu0 %v22_v0  ;;  %v129_v5 = vld [vmem:[%s445_s3 + $0x88] sm:$0xff]  ;;  %v131_v10 = vld [vmem:[%s445_s3 + $0x98] sm:$0xff]  ;;  %v26_v53 = vshrl.u32 %v25_v52, 7 }
   0x3   :  { %v128_v4 = vld [vmem:[%s445_s3 + $0x80] sm:$0xff]  ;;  %40 = vmatpush1.msra.mxu0 %v21_v1  ;;  %v113_v8 = vld [vmem:[%s445_s3 + $0x8] sm:$0xff]  ;;  %v269_v12 = vpack.c.bf16 %v131_v10, %v130_v9  ;;  %v114_v13 = vld [vmem:[%s445_s3 + $0x10] sm:$0xff] }
   0x4   :  { %v112_v6 = vld [vmem:[%s445_s3] sm:$0xff]  ;;  %v265_v7 = vpack.c.bf16 %v129_v5, %v128_v4  ;;  %228 = vmatmul.mubr.msk.f32.vlgmr.msra.gmra.mrb[0].mxu0 %vm35_vm0, %v20_v3  ;;  %v115_v14 = vld [vmem:[%s445_s3 + $0x18] sm:$0xff]  ;;  %v133_v16 = vld [vmem:[%s445_s3 + $0xa8] sm:$0xff]  ;;  %v27_v54 = vsub.s32 0, %v26_v53  ;;  %v31_v56 = vsub.s32 1, %v26_v53 }
   0x5   :  { %v267_v11 = vpack.c.bf16 %v113_v8, %v112_v6  ;;  %v132_v15 = vld [vmem:[%s445_s3 + $0xa0] sm:$0xff]  ;;  %v271_v17 = vpack.c.bf16 %v115_v14, %v114_v13  ;;  %v117_v20 = vld [vmem:[%s445_s3 + $0x28] sm:$0xff]  ;;  %v134_v21 = vld [vmem:[%s445_s3 + $0xb0] sm:$0xff] }
   0x6   :  { %266 = vmatprep.subr.bf16.mxu1 %v265_v7  ;;  %v273_v18 = vpack.c.bf16 %v133_v16, %v132_v15  ;;  %v116_v19 = vld [vmem:[%s445_s3 + $0x20] sm:$0xff]  ;;  %v135_v22 = vld [vmem:[%s445_s3 + $0xb8] sm:$0xff]  ;;  %v118_v25 = vld [vmem:[%s445_s3 + $0x30] sm:$0xff] }
   0x7   :  { %268 = vmatpush3.bf16.msra.mxu1 %v267_v11  ;;  %v275_v23 = vpack.c.bf16 %v117_v20, %v116_v19  ;;  %v277_v24 = vpack.c.bf16 %v135_v22, %v134_v21  ;;  %v119_v26 = vld [vmem:[%s445_s3 + $0x38] sm:$0xff]  ;;  %v136_v27 = vld [vmem:[%s445_s3 + $0xc0] sm:$0xff]  ;;  %v137_v28 = vld [vmem:[%s445_s3 + $0xc8] sm:$0xff] }
   0x8   :  { %270 = vmatprep.subr.bf16.mxu1 %v269_v12  ;;  %v279_v29 = vpack.c.bf16 %v119_v26, %v118_v25  ;;  %v281_v30 = vpack.c.bf16 %v137_v28, %v136_v27  ;;  %v120_v31 = vld [vmem:[%s445_s3 + $0x40] sm:$0xff]  ;;  %v121_v32 = vld [vmem:[%s445_s3 + $0x48] sm:$0xff]  ;;  %v138_v33 = vld [vmem:[%s445_s3 + $0xd0] sm:$0xff] }
   0x9   :  { %v139_v34 = vld [vmem:[%s445_s3 + $0xd8] sm:$0xff]  ;;  %v283_v35 = vpack.c.bf16 %v121_v32, %v120_v31  ;;  %v122_v37 = vld [vmem:[%s445_s3 + $0x50] sm:$0xff]  ;;  %v140_v39 = vld [vmem:[%s445_s3 + $0xe0] sm:$0xff] }
   0xa   :  { %v285_v36 = vpack.c.bf16 %v139_v34, %v138_v33  ;;  %v123_v38 = vld [vmem:[%s445_s3 + $0x58] sm:$0xff]  ;;  %v141_v40 = vld [vmem:[%s445_s3 + $0xe8] sm:$0xff]  ;;  %v124_v43 = vld [vmem:[%s445_s3 + $0x60] sm:$0xff] }
   0xb   :  { %272 = vmatpush3.bf16.msra.mxu1 %v271_v17  ;;  %v287_v41 = vpack.c.bf16 %v123_v38, %v122_v37  ;;  %v289_v42 = vpack.c.bf16 %v141_v40, %v140_v39  ;;  %v125_v44 = vld [vmem:[%s445_s3 + $0x68] sm:$0xff]  ;;  %v142_v46 = vld [vmem:[%s445_s3 + $0xf0] sm:$0xff]  ;;  %v143_v47 = vld [vmem:[%s445_s3 + $0xf8] sm:$0xff] }
   0xc   :  { %274 = vmatprep.subr.bf16.mxu1 %v273_v18  ;;  %v291_v45 = vpack.c.bf16 %v125_v44, %v124_v43  ;;  %v293_v48 = vpack.c.bf16 %v143_v47, %v142_v46  ;;  %v126_v49 = vld [vmem:[%s445_s3 + $0x70] sm:$0xff]  ;;  %v127_v50 = vld [vmem:[%s445_s3 + $0x78] sm:$0xff]  ;;  %v23_v55 = vld [vmem:[%s446_s2] sm:$0x3] }
   0xd   :  { %v295_v51 = vpack.c.bf16 %v127_v50, %v126_v49  ;;  %v28_v57 = vrot.slane %v23_v55, %v27_v54  ;;  %v32_v58 = vrot.slane %v23_v55, %v31_v56  ;;  %v229_v3 = vld [vmem:[%s447_s4] ss:$0 sm:$0xff] }
   0xf   :  { %276 = vmatpush3.bf16.msra.mxu1 %v275_v23 }
  0x10   :  { %278 = vmatprep.subr.bf16.mxu1 %v277_v24 }
  0x13   :  { %280 = vmatpush3.bf16.msra.mxu1 %v279_v29 }
  0x14   :  { %282 = vmatprep.subr.bf16.mxu1 %v281_v30 }
  0x17   :  { %284 = vmatpush3.bf16.msra.mxu1 %v283_v35 }
  0x18   :  { %286 = vmatprep.subr.bf16.mxu1 %v285_v36 }
  0x1b   :  { %288 = vmatpush3.bf16.msra.mxu1 %v287_v41 }
  0x1c   :  { %290 = vmatprep.subr.bf16.mxu1 %v289_v42 }
  0x1f   :  { %292 = vmatpush3.bf16.msra.mxu1 %v291_v45 }
  0x20   :  { %294 = vmatprep.subr.bf16.mxu1 %v293_v48 }
  0x23   :  { %296 = vmatpush3.bf16.msra.mxu1 %v295_v51 }
  0xd7   :  { %v105_v59 = vpop.f32.mrb[0].mxu0 }
  0xd8   :  { %v106_v60 = vadd.f32 %v105_v59, %v28_v57  ;;  %v107_v61 = vpop.f32.mrb[1].mxu0 }
  0xd9   :  { %v108_v62 = vadd.f32 %v107_v61, %v32_v58 }
  0xda   :  { %v110_v0 = vmax.f32 %v106_v60, 0.0 }
  0xdb   :  { %v111_v63 = vmax.f32 %v108_v62, 0.0 }
  0xdd   :  { %208 = vmatprep.mubr.f32.mxu1 %v111_v63 }
  0xde   :  { %209 = vmatmul.mubr.f32.vlgmr.msra.gmra.mrb[0].mxu1 %v110_v0 }
 0x1b1   :  { %v262_v1 = vpop.f32.mrb[0].mxu1 }
 0x1b2   :  { %v263_v2 = vpop.f32.mrb[1].mxu1 }
 0x1b3   :  { %v264_v4 = vadd.f32 %v263_v2, %v262_v1 }
 0x1b5   :  { %v221_v5 = vadd.f32 %v264_v4, %v229_v3 }
 0x1b7   :  { %223 = vst.msk [vmem:[%s448_s5] sm:$0xff] %vm222_vm1, %v221_v5 }

</bundles_post_ra>
